<compile_context>
chip_gen: v5e
topology: v5e:2x2
jax: 0.10.0
libtpu: 0.0.40
codegen_flags: <defaults>
</compile_context>

<pallas_src>
from functools import partial
import math

import jax
import jax.numpy as jnp
from jax import lax
from jax.experimental import pallas as pl
from jax.experimental.pallas import tpu as pltpu


_MAX_TILE_ROWS = 4096     # 4096x128 f32 = 2 MiB per input buffer (x2 inputs x2 bufs = 8 MiB).
_NUM_SPLITS = 2           # leading "parallel" grid axis -> 2 TensorCores on v7x.
_PAD_LOGIT = -100.0       # sigmoid(-100) == 0 and log1p(exp(-100)) == 0 in f32.


def _row_granule(dtype):
    """Sublane granularity (rows of 128 lanes) required by the packed dtype."""
    itemsize = jnp.dtype(dtype).itemsize
    if itemsize >= 4:
        return 8
    if itemsize == 2:
        return 16
    return 32


def _finalize(inter, union, bce_sum, eps, n_elems):
    eps = jnp.float32(eps)
    iou = (inter + eps * (union == 0.0).astype(jnp.float32)) / (union - inter + eps)
    return (1.0 - iou) + bce_sum / jnp.float32(n_elems)


def _bce_iou_kernel(x_ref, t_ref, inter_ref, union_ref, bce_ref, *,
                    tile_rows, rows, blocks_per_split, needs_mask):
    c = pl.program_id(0)          # split index (TensorCore on v7x)
    i = pl.program_id(1)          # reduction step within the split
    g = tile_rows // 8

    # Output blocks are resident across the "arbitrary" axis -> init at step 0.
    @pl.when(i == 0)
    def _():
        inter_ref[...] = jnp.zeros_like(inter_ref)
        union_ref[...] = jnp.zeros_like(union_ref)
        bce_ref[...] = jnp.zeros_like(bce_ref)

    # Per-tile cast to f32 (inputs stream in their native dtypes from HBM).
    x = x_ref[...].astype(jnp.float32)
    t = t_ref[...].astype(jnp.float32)

    def accumulate(xv, tv):
        # One shared exp feeds both sigmoid and the BCE softplus:
        #   e = exp(-|x|)
        #   sigmoid(x) = 1/(1+e) if x>=0 else e/(1+e)
        #   softplus(-|x|) = log1p(e)
        e = jnp.exp(-jnp.abs(xv))
        inv = 1.0 / (1.0 + e)                 # exact; EUP reciprocal + Newton
        s = jnp.where(xv >= 0.0, inv, e * inv)
        bce_el = jnp.maximum(xv, 0.0) - xv * tv + jnp.log1p(e)

        def vsum(v):
            # Collapse the tile onto one (1,8,128) slab with pure VPU adds;
            # the cross-sublane/-lane reduction happens once, in the wrapper.
            return jnp.sum(v.reshape(g, 8, 128), axis=0, keepdims=True)

        inter_ref[...] += vsum(tv * s)
        union_ref[...] += vsum(tv + s)        # sum(t)+sum(s) folded together
        bce_ref[...] += vsum(bce_el)

    if needs_mask:
        # Compile-time `rows`; only tail / duplicated (clamped) blocks pay for
        # the mask, interior blocks take the clean path below.
        row_start = (c * blocks_per_split + i) * tile_rows
        remaining = rows - row_start

        @pl.when(remaining >= tile_rows)
        def _():
            accumulate(x, t)

        @pl.when(remaining < tile_rows)
        def _():
            rid = lax.broadcasted_iota(jnp.int32, (tile_rows, 128), 0)
            valid = rid < remaining          # all-False for fully out-of-range blocks
            accumulate(jnp.where(valid, x, _PAD_LOGIT),
                       jnp.where(valid, t, 0.0))
    else:
        accumulate(x, t)


def bce_iou_loss(outputs, targets, *, eps=1e-7):
    """BCEIoULoss forward (mode='hard', activation='sigmoid', reduction='mean')."""
    assert outputs.shape == targets.shape, (outputs.shape, targets.shape)
    total = math.prod(outputs.shape)

    x_flat = outputs.reshape(-1)      # free bitcast reshape, native dtype
    t_flat = targets.reshape(-1)

    granule = max(_row_granule(x_flat.dtype), _row_granule(t_flat.dtype))

    # Degenerate sizes (< one minimal tile): a kernel launch is pure overhead.
    if total < granule * 128:
        x32 = x_flat.astype(jnp.float32)
        t32 = t_flat.astype(jnp.float32)
        e = jnp.exp(-jnp.abs(x32))
        inv = 1.0 / (1.0 + e)
        s = jnp.where(x32 >= 0.0, inv, e * inv)
        bce_sum = jnp.sum(jnp.maximum(x32, 0.0) - x32 * t32 + jnp.log1p(e))
        return _finalize(jnp.sum(t32 * s), jnp.sum(t32) + jnp.sum(s),
                         bce_sum, eps, total)

    # Lane-dense (rows, 128) view.  total % 128 == 0 -> zero-copy reshape.
    # Otherwise append <=127 neutral pad elements (logit=-100 -> contributes ~0
    # to every sum, target=0); this is the only remaining copying path and only
    # triggers for 128-ragged element counts.
    pad_n = (-total) % 128
    if pad_n:
        x_flat = jnp.concatenate(
            [x_flat, jnp.full((pad_n,), _PAD_LOGIT, dtype=x_flat.dtype)])
        t_flat = jnp.concatenate(
            [t_flat, jnp.zeros((pad_n,), dtype=t_flat.dtype)])
    rows = (total + pad_n) // 128
    x2 = x_flat.reshape(rows, 128)
    t2 = t_flat.reshape(rows, 128)

    tile_rows = min(_MAX_TILE_ROWS, (rows // granule) * granule)
    num_blocks = pl.cdiv(rows, tile_rows)
    blocks_per_split = pl.cdiv(num_blocks, _NUM_SPLITS)
    # Mask code is only emitted when some grid step sees a partial / duplicated block.
    needs_mask = rows != _NUM_SPLITS * blocks_per_split * tile_rows

    def in_idx(c, i):
        # Clamp so duplicated trailing steps re-read a valid block (their
        # contribution is zeroed by the in-kernel mask).
        return (jnp.minimum(c * blocks_per_split + i, num_blocks - 1), 0)

    def out_idx(c, i):
        return (c, 0, 0)

    part_shape = jax.ShapeDtypeStruct((_NUM_SPLITS, 8, 128), jnp.float32)
    kernel = partial(_bce_iou_kernel, tile_rows=tile_rows, rows=rows,
                     blocks_per_split=blocks_per_split, needs_mask=needs_mask)

    inter_p, union_p, bce_p = pl.pallas_call(
        kernel,
        out_shape=(part_shape, part_shape, part_shape),
        grid_spec=pltpu.PrefetchScalarGridSpec(
            num_scalar_prefetch=0,
            grid=(_NUM_SPLITS, blocks_per_split),
            in_specs=[
                pl.BlockSpec((tile_rows, 128), in_idx),
                pl.BlockSpec((tile_rows, 128), in_idx),
            ],
            out_specs=[
                pl.BlockSpec((1, 8, 128), out_idx),
                pl.BlockSpec((1, 8, 128), out_idx),
                pl.BlockSpec((1, 8, 128), out_idx),
            ],
        ),
        compiler_params=pltpu.CompilerParams(
            dimension_semantics=("parallel", "arbitrary"),
            vmem_limit_bytes=32 << 20,
        ),
        cost_estimate=pl.CostEstimate(
            flops=14 * total,
            transcendentals=3 * total,
            bytes_accessed=total * (jnp.dtype(outputs.dtype).itemsize
                                    + jnp.dtype(targets.dtype).itemsize)
            + 3 * _NUM_SPLITS * 8 * 128 * 4,
        ),
    )(x2, t2)

    # Tiny cross-split / cross-lane reductions + the scalar IoU/BCE math are
    # cheapest as plain XLA ops on the (2, 8, 128) partial sums.
    return _finalize(jnp.sum(inter_p), jnp.sum(union_p), jnp.sum(bce_p),
                     eps, total)


def _reference(outputs, targets, eps=1e-7):
    x = outputs.astype(jnp.float32)
    t = targets.astype(jnp.float32)
    s = jax.nn.sigmoid(x)
    inter = jnp.sum(t * s)
    union = jnp.sum(t) + jnp.sum(s)
    iou = (inter + eps * (union == 0).astype(jnp.float32)) / (union - inter + eps)
    bce = jnp.mean(jnp.maximum(x, 0.0) - x * t + jnp.log1p(jnp.exp(-jnp.abs(x))))
    return (1.0 - iou) + bce


if __name__ == "__main__":
    key = jax.random.PRNGKey(0)
    k1, k2 = jax.random.split(key)
    B, C, H, W = 2, 4, 16, 16
    outputs = jax.random.normal(k1, (B, C, H, W), dtype=jnp.float32)   # logits
    targets = (jax.random.uniform(k2, (B, C, H, W)) > 0.5).astype(jnp.float32)

    loss = bce_iou_loss(outputs, targets)
    jax.block_until_ready(loss)
    ref = _reference(outputs, targets)
    assert jnp.allclose(loss, ref, rtol=1e-5, atol=1e-5), (loss, ref)

    # Ragged (total % 128 != 0) path: pad-to-128 + in-kernel row masking.
    o2 = jax.random.normal(k1, (3, 3, 11, 13), dtype=jnp.float32)
    t2 = (jax.random.uniform(k2, (3, 3, 11, 13)) > 0.5).astype(jnp.float32)
    loss2 = bce_iou_loss(o2, t2)
    jax.block_until_ready(loss2)
    assert jnp.allclose(loss2, _reference(o2, t2), rtol=1e-5, atol=1e-5)

    # Native bf16 logits streamed without any wrapper-side f32 copy.
    o3 = outputs.astype(jnp.bfloat16)
    loss3 = bce_iou_loss(o3, targets)
    jax.block_until_ready(loss3)
    assert jnp.allclose(loss3, _reference(o3, targets), rtol=1e-5, atol=1e-5)

    print("KERNEL_OK")
</pallas_src>

<mosaic_0001>
module attributes {stable_mosaic.version = 11 : i64} {
  func.func @_bce_iou_kernel(%arg0: i32, %arg1: i32, %arg2: memref<16x128xf32, #tpu.memory_space<vmem>>, %arg3: memref<16x128xf32, #tpu.memory_space<vmem>>, %arg4: memref<1x8x128xf32, #tpu.memory_space<vmem>>, %arg5: memref<1x8x128xf32, #tpu.memory_space<vmem>>, %arg6: memref<1x8x128xf32, #tpu.memory_space<vmem>>) attributes {dimension_semantics = [#tpu.dimension_semantics<parallel>, #tpu.dimension_semantics<arbitrary>], iteration_bounds = array<i64: 2, 1>, scalar_prefetch = 0 : i64, scratch_operands = 0 : i64, tpu.core_type = #tpu.core_type<tc>, window_params = [{transform_indices = @transform_0, window_bounds = array<i64: 16, 128>}, {transform_indices = @transform_1, window_bounds = array<i64: 16, 128>}, {transform_indices = @transform_2, window_bounds = array<i64: 1, 8, 128>}, {transform_indices = @transform_3, window_bounds = array<i64: 1, 8, 128>}, {transform_indices = @transform_4, window_bounds = array<i64: 1, 8, 128>}]} {
    %c0_i32 = arith.constant 0 : i32
    %0 = arith.cmpi eq, %arg1, %c0_i32 : i32
    %1 = arith.extui %0 : i1 to i32
    %c0_i32_0 = arith.constant 0 : i32
    %2 = arith.cmpi ne, %1, %c0_i32_0 : i32
    scf.if %2 {
      %cst = arith.constant 0.000000e+00 : f32
      %15 = vector.broadcast %cst : f32 to vector<1x8x128xf32>
      %c0_9 = arith.constant 0 : index
      %c0_10 = arith.constant 0 : index
      %c0_11 = arith.constant 0 : index
      %16 = vector.load %arg4[%c0_9, %c0_10, %c0_11] : memref<1x8x128xf32, #tpu.memory_space<vmem>>, vector<1x8x128xf32>
      tpu.vector_store %arg4[%c0_9, %c0_10, %c0_11], %15 {strides = array<i32>} : memref<1x8x128xf32, #tpu.memory_space<vmem>>, vector<1x8x128xf32>,
      %cst_12 = arith.constant 0.000000e+00 : f32
      %17 = vector.broadcast %cst_12 : f32 to vector<1x8x128xf32>
      %c0_13 = arith.constant 0 : index
      %c0_14 = arith.constant 0 : index
      %c0_15 = arith.constant 0 : index
      %18 = vector.load %arg5[%c0_13, %c0_14, %c0_15] : memref<1x8x128xf32, #tpu.memory_space<vmem>>, vector<1x8x128xf32>
      tpu.vector_store %arg5[%c0_13, %c0_14, %c0_15], %17 {strides = array<i32>} : memref<1x8x128xf32, #tpu.memory_space<vmem>>, vector<1x8x128xf32>,
      %cst_16 = arith.constant 0.000000e+00 : f32
      %19 = vector.broadcast %cst_16 : f32 to vector<1x8x128xf32>
      %c0_17 = arith.constant 0 : index
      %c0_18 = arith.constant 0 : index
      %c0_19 = arith.constant 0 : index
      %20 = vector.load %arg6[%c0_17, %c0_18, %c0_19] : memref<1x8x128xf32, #tpu.memory_space<vmem>>, vector<1x8x128xf32>
      tpu.vector_store %arg6[%c0_17, %c0_18, %c0_19], %19 {strides = array<i32>} : memref<1x8x128xf32, #tpu.memory_space<vmem>>, vector<1x8x128xf32>,
    } else {
    }
    %c0 = arith.constant 0 : index
    %c0_1 = arith.constant 0 : index
    %3 = vector.load %arg2[%c0, %c0_1] : memref<16x128xf32, #tpu.memory_space<vmem>>, vector<16x128xf32>
    %c0_2 = arith.constant 0 : index
    %c0_3 = arith.constant 0 : index
    %4 = vector.load %arg3[%c0_2, %c0_3] : memref<16x128xf32, #tpu.memory_space<vmem>>, vector<16x128xf32>
    %c1_i32 = arith.constant 1 : i32
    %5 = arith.muli %arg0, %c1_i32 : i32
    %6 = arith.addi %5, %arg1 : i32
    %c16_i32 = arith.constant 16 : i32
    %7 = arith.muli %6, %c16_i32 : i32
    %c16_i32_4 = arith.constant 16 : i32
    %8 = arith.subi %c16_i32_4, %7 : i32
    %c16_i32_5 = arith.constant 16 : i32
    %9 = arith.cmpi sge, %8, %c16_i32_5 : i32
    %10 = arith.extui %9 : i1 to i32
    %c0_i32_6 = arith.constant 0 : i32
    %11 = arith.cmpi ne, %10, %c0_i32_6 : i32
    scf.if %11 {
      %15 = math.absf %3 : vector<16x128xf32>
      %cst = arith.constant 0.000000e+00 : f32
      %16 = vector.broadcast %cst : f32 to vector<16x128xf32>
      %17 = arith.subf %16, %15 : vector<16x128xf32>
      %18 = math.exp %17 : vector<16x128xf32>
      %cst_9 = arith.constant 1.000000e+00 : f32
      %19 = vector.broadcast %cst_9 : f32 to vector<16x128xf32>
      %20 = arith.addf %19, %18 : vector<16x128xf32>
      %cst_10 = arith.constant 1.000000e+00 : f32
      %21 = vector.broadcast %cst_10 : f32 to vector<16x128xf32>
      %22 = arith.divf %21, %20 : vector<16x128xf32>
      %cst_11 = arith.constant 0.000000e+00 : f32
      %23 = vector.broadcast %cst_11 : f32 to vector<16x128xf32>
      %24 = arith.cmpf oge, %3, %23 : vector<16x128xf32>
      %25 = arith.mulf %18, %22 : vector<16x128xf32>
      %26 = arith.select %24, %22, %25 : vector<16x128xi1>, vector<16x128xf32>
      %cst_12 = arith.constant 0.000000e+00 : f32
      %27 = vector.broadcast %cst_12 : f32 to vector<16x128xf32>
      %28 = arith.maximumf %3, %27 : vector<16x128xf32>
      %29 = arith.mulf %3, %4 : vector<16x128xf32>
      %30 = arith.subf %28, %29 : vector<16x128xf32>
      %31 = math.log1p %18 : vector<16x128xf32>
      %32 = arith.addf %30, %31 : vector<16x128xf32>
      %c0_13 = arith.constant 0 : index
      %c0_14 = arith.constant 0 : index
      %c0_15 = arith.constant 0 : index
      %33 = vector.load %arg4[%c0_13, %c0_14, %c0_15] : memref<1x8x128xf32, #tpu.memory_space<vmem>>, vector<1x8x128xf32>
      %34 = arith.mulf %4, %26 : vector<16x128xf32>
      %35 = vector.shape_cast %34 : vector<16x128xf32> to vector<2x8x128xf32>
      %cst_16 = arith.constant dense<0.000000e+00> : vector<8x128xf32>
      %36 = vector.multi_reduction <add>, %35, %cst_16 [0] : vector<2x8x128xf32> to vector<8x128xf32>
      %37 = vector.shape_cast %36 : vector<8x128xf32> to vector<1x8x128xf32>
      %38 = arith.addf %33, %37 : vector<1x8x128xf32>
      %c0_17 = arith.constant 0 : index
      %c0_18 = arith.constant 0 : index
      %c0_19 = arith.constant 0 : index
      %39 = vector.load %arg4[%c0_17, %c0_18, %c0_19] : memref<1x8x128xf32, #tpu.memory_space<vmem>>, vector<1x8x128xf32>
      tpu.vector_store %arg4[%c0_17, %c0_18, %c0_19], %38 {strides = array<i32>} : memref<1x8x128xf32, #tpu.memory_space<vmem>>, vector<1x8x128xf32>,
      %c0_20 = arith.constant 0 : index
      %c0_21 = arith.constant 0 : index
      %c0_22 = arith.constant 0 : index
      %40 = vector.load %arg5[%c0_20, %c0_21, %c0_22] : memref<1x8x128xf32, #tpu.memory_space<vmem>>, vector<1x8x128xf32>
      %41 = arith.addf %4, %26 : vector<16x128xf32>
      %42 = vector.shape_cast %41 : vector<16x128xf32> to vector<2x8x128xf32>
      %cst_23 = arith.constant dense<0.000000e+00> : vector<8x128xf32>
      %43 = vector.multi_reduction <add>, %42, %cst_23 [0] : vector<2x8x128xf32> to vector<8x128xf32>
      %44 = vector.shape_cast %43 : vector<8x128xf32> to vector<1x8x128xf32>
      %45 = arith.addf %40, %44 : vector<1x8x128xf32>
      %c0_24 = arith.constant 0 : index
      %c0_25 = arith.constant 0 : index
      %c0_26 = arith.constant 0 : index
      %46 = vector.load %arg5[%c0_24, %c0_25, %c0_26] : memref<1x8x128xf32, #tpu.memory_space<vmem>>, vector<1x8x128xf32>
      tpu.vector_store %arg5[%c0_24, %c0_25, %c0_26], %45 {strides = array<i32>} : memref<1x8x128xf32, #tpu.memory_space<vmem>>, vector<1x8x128xf32>,
      %c0_27 = arith.constant 0 : index
      %c0_28 = arith.constant 0 : index
      %c0_29 = arith.constant 0 : index
      %47 = vector.load %arg6[%c0_27, %c0_28, %c0_29] : memref<1x8x128xf32, #tpu.memory_space<vmem>>, vector<1x8x128xf32>
      %48 = vector.shape_cast %32 : vector<16x128xf32> to vector<2x8x128xf32>
      %cst_30 = arith.constant dense<0.000000e+00> : vector<8x128xf32>
      %49 = vector.multi_reduction <add>, %48, %cst_30 [0] : vector<2x8x128xf32> to vector<8x128xf32>
      %50 = vector.shape_cast %49 : vector<8x128xf32> to vector<1x8x128xf32>
      %51 = arith.addf %47, %50 : vector<1x8x128xf32>
      %c0_31 = arith.constant 0 : index
      %c0_32 = arith.constant 0 : index
      %c0_33 = arith.constant 0 : index
      %52 = vector.load %arg6[%c0_31, %c0_32, %c0_33] : memref<1x8x128xf32, #tpu.memory_space<vmem>>, vector<1x8x128xf32>
      tpu.vector_store %arg6[%c0_31, %c0_32, %c0_33], %51 {strides = array<i32>} : memref<1x8x128xf32, #tpu.memory_space<vmem>>, vector<1x8x128xf32>,
    } else {
    }
    %c16_i32_7 = arith.constant 16 : i32
    %12 = arith.cmpi slt, %8, %c16_i32_7 : i32
    %13 = arith.extui %12 : i1 to i32
    %c0_i32_8 = arith.constant 0 : i32
    %14 = arith.cmpi ne, %13, %c0_i32_8 : i32
    scf.if %14 {
      %15 = tpu.iota {dimensions = array<i32: 0>} : vector<16x128xi32>
      %16 = vector.broadcast %8 : i32 to vector<16x128xi32>
      %17 = arith.cmpi slt, %15, %16 : vector<16x128xi32>
      %cst = arith.constant -1.000000e+02 : f32
      %18 = vector.broadcast %cst : f32 to vector<16x128xf32>
      %19 = arith.select %17, %3, %18 : vector<16x128xi1>, vector<16x128xf32>
      %cst_9 = arith.constant 0.000000e+00 : f32
      %20 = vector.broadcast %cst_9 : f32 to vector<16x128xf32>
      %21 = arith.select %17, %4, %20 : vector<16x128xi1>, vector<16x128xf32>
      %22 = math.absf %19 : vector<16x128xf32>
      %cst_10 = arith.constant 0.000000e+00 : f32
      %23 = vector.broadcast %cst_10 : f32 to vector<16x128xf32>
      %24 = arith.subf %23, %22 : vector<16x128xf32>
      %25 = math.exp %24 : vector<16x128xf32>
      %cst_11 = arith.constant 1.000000e+00 : f32
      %26 = vector.broadcast %cst_11 : f32 to vector<16x128xf32>
      %27 = arith.addf %26, %25 : vector<16x128xf32>
      %cst_12 = arith.constant 1.000000e+00 : f32
      %28 = vector.broadcast %cst_12 : f32 to vector<16x128xf32>
      %29 = arith.divf %28, %27 : vector<16x128xf32>
      %cst_13 = arith.constant 0.000000e+00 : f32
      %30 = vector.broadcast %cst_13 : f32 to vector<16x128xf32>
      %31 = arith.cmpf oge, %19, %30 : vector<16x128xf32>
      %32 = arith.mulf %25, %29 : vector<16x128xf32>
      %33 = arith.select %31, %29, %32 : vector<16x128xi1>, vector<16x128xf32>
      %cst_14 = arith.constant 0.000000e+00 : f32
      %34 = vector.broadcast %cst_14 : f32 to vector<16x128xf32>
      %35 = arith.maximumf %19, %34 : vector<16x128xf32>
      %36 = arith.mulf %19, %21 : vector<16x128xf32>
      %37 = arith.subf %35, %36 : vector<16x128xf32>
      %38 = math.log1p %25 : vector<16x128xf32>
      %39 = arith.addf %37, %38 : vector<16x128xf32>
      %c0_15 = arith.constant 0 : index
      %c0_16 = arith.constant 0 : index
      %c0_17 = arith.constant 0 : index
      %40 = vector.load %arg4[%c0_15, %c0_16, %c0_17] : memref<1x8x128xf32, #tpu.memory_space<vmem>>, vector<1x8x128xf32>
      %41 = arith.mulf %21, %33 : vector<16x128xf32>
      %42 = vector.shape_cast %41 : vector<16x128xf32> to vector<2x8x128xf32>
      %cst_18 = arith.constant dense<0.000000e+00> : vector<8x128xf32>
      %43 = vector.multi_reduction <add>, %42, %cst_18 [0] : vector<2x8x128xf32> to vector<8x128xf32>
      %44 = vector.shape_cast %43 : vector<8x128xf32> to vector<1x8x128xf32>
      %45 = arith.addf %40, %44 : vector<1x8x128xf32>
      %c0_19 = arith.constant 0 : index
      %c0_20 = arith.constant 0 : index
      %c0_21 = arith.constant 0 : index
      %46 = vector.load %arg4[%c0_19, %c0_20, %c0_21] : memref<1x8x128xf32, #tpu.memory_space<vmem>>, vector<1x8x128xf32>
      tpu.vector_store %arg4[%c0_19, %c0_20, %c0_21], %45 {strides = array<i32>} : memref<1x8x128xf32, #tpu.memory_space<vmem>>, vector<1x8x128xf32>,
      %c0_22 = arith.constant 0 : index
      %c0_23 = arith.constant 0 : index
      %c0_24 = arith.constant 0 : index
      %47 = vector.load %arg5[%c0_22, %c0_23, %c0_24] : memref<1x8x128xf32, #tpu.memory_space<vmem>>, vector<1x8x128xf32>
      %48 = arith.addf %21, %33 : vector<16x128xf32>
      %49 = vector.shape_cast %48 : vector<16x128xf32> to vector<2x8x128xf32>
      %cst_25 = arith.constant dense<0.000000e+00> : vector<8x128xf32>
      %50 = vector.multi_reduction <add>, %49, %cst_25 [0] : vector<2x8x128xf32> to vector<8x128xf32>
      %51 = vector.shape_cast %50 : vector<8x128xf32> to vector<1x8x128xf32>
      %52 = arith.addf %47, %51 : vector<1x8x128xf32>
      %c0_26 = arith.constant 0 : index
      %c0_27 = arith.constant 0 : index
      %c0_28 = arith.constant 0 : index
      %53 = vector.load %arg5[%c0_26, %c0_27, %c0_28] : memref<1x8x128xf32, #tpu.memory_space<vmem>>, vector<1x8x128xf32>
      tpu.vector_store %arg5[%c0_26, %c0_27, %c0_28], %52 {strides = array<i32>} : memref<1x8x128xf32, #tpu.memory_space<vmem>>, vector<1x8x128xf32>,
      %c0_29 = arith.constant 0 : index
      %c0_30 = arith.constant 0 : index
      %c0_31 = arith.constant 0 : index
      %54 = vector.load %arg6[%c0_29, %c0_30, %c0_31] : memref<1x8x128xf32, #tpu.memory_space<vmem>>, vector<1x8x128xf32>
      %55 = vector.shape_cast %39 : vector<16x128xf32> to vector<2x8x128xf32>
      %cst_32 = arith.constant dense<0.000000e+00> : vector<8x128xf32>
      %56 = vector.multi_reduction <add>, %55, %cst_32 [0] : vector<2x8x128xf32> to vector<8x128xf32>
      %57 = vector.shape_cast %56 : vector<8x128xf32> to vector<1x8x128xf32>
      %58 = arith.addf %54, %57 : vector<1x8x128xf32>
      %c0_33 = arith.constant 0 : index
      %c0_34 = arith.constant 0 : index
      %c0_35 = arith.constant 0 : index
      %59 = vector.load %arg6[%c0_33, %c0_34, %c0_35] : memref<1x8x128xf32, #tpu.memory_space<vmem>>, vector<1x8x128xf32>
      tpu.vector_store %arg6[%c0_33, %c0_34, %c0_35], %58 {strides = array<i32>} : memref<1x8x128xf32, #tpu.memory_space<vmem>>, vector<1x8x128xf32>,
    } else {
    }
    return
  }
  func.func @transform_0(%arg0: i32, %arg1: i32) -> (i32, i32) {
    %c1_i32 = arith.constant 1 : i32
    %0 = arith.muli %arg0, %c1_i32 : i32
    %1 = arith.addi %0, %arg1 : i32
    %c0_i32 = arith.constant 0 : i32
    %2 = arith.minsi %1, %c0_i32 : i32
    %c0_i32_0 = arith.constant 0 : i32
    %c0_i32_1 = arith.constant 0 : i32
    return %2, %c0_i32_0 : i32, i32
  }
  func.func @transform_1(%arg0: i32, %arg1: i32) -> (i32, i32) {
    %c1_i32 = arith.constant 1 : i32
    %0 = arith.muli %arg0, %c1_i32 : i32
    %1 = arith.addi %0, %arg1 : i32
    %c0_i32 = arith.constant 0 : i32
    %2 = arith.minsi %1, %c0_i32 : i32
    %c0_i32_0 = arith.constant 0 : i32
    %c0_i32_1 = arith.constant 0 : i32
    return %2, %c0_i32_0 : i32, i32
  }
  func.func @transform_2(%arg0: i32, %arg1: i32) -> (i32, i32, i32) {
    %c0_i32 = arith.constant 0 : i32
    %c0_i32_0 = arith.constant 0 : i32
    %c0_i32_1 = arith.constant 0 : i32
    return %arg0, %c0_i32, %c0_i32_0 : i32, i32, i32
  }
  func.func @transform_3(%arg0: i32, %arg1: i32) -> (i32, i32, i32) {
    %c0_i32 = arith.constant 0 : i32
    %c0_i32_0 = arith.constant 0 : i32
    %c0_i32_1 = arith.constant 0 : i32
    return %arg0, %c0_i32, %c0_i32_0 : i32, i32, i32
  }
  func.func @transform_4(%arg0: i32, %arg1: i32) -> (i32, i32, i32) {
    %c0_i32 = arith.constant 0 : i32
    %c0_i32_0 = arith.constant 0 : i32
    %c0_i32_1 = arith.constant 0 : i32
    return %arg0, %c0_i32, %c0_i32_0 : i32, i32, i32
  }
}

</mosaic_0001>

<bundles_post_ra>
// kernel: tpu_custom_call.1
= control target key start
LH: loop header
LB: loop body
LE: loop exit
PB: predicated region body
PF: predicated region fallthrough
CT: control target
= control target key end

     0   :  { %s1516_s0 = inlined_call_operand.hbm [shape: f32[16,128], index: 0, kind: input, shape index: {}]   ;;  %s1517_s1 = inlined_call_operand.hbm [shape: f32[16,128], index: 1, kind: input, shape index: {}]   ;;  %s1518_s2 = inlined_call_operand.hbm [shape: f32[2,8,128], index: 2, kind: output, shape index: {0}]   ;;  %s1519_s3 = inlined_call_operand.hbm [shape: f32[2,8,128], index: 3, kind: output, shape index: {1}]   ;;  %s1520_s4 = inlined_call_operand.hbm [shape: f32[2,8,128], index: 4, kind: output, shape index: {2}]  }
   0x1   :  { %1523 = sst [smem:[#allocation15_spill]] %s1516_s0 }
   0x2   :  { %10 = vsyncpa [#allocation3], 0 }
   0x3   :  { %12 = vsyncpa [#allocation3 + $0x1], 0 }
   0x4   :  { %13 = vsyncpa [#allocation6], 0 }
   0x5   :  { %15 = vsyncpa [#allocation6 + $0x1], 0 }
   0x6   :  { %16 = vsyncpa [#allocation4], 0 }
   0x7   :  { %18 = vsyncpa [#allocation4 + $0x1], 0 }
   0x8   :  { %19 = vsyncpa [#allocation9], 0 }
   0x9   :  { %21 = vsyncpa [#allocation9 + $0x1], 0  ;;  %s1158_s15 = smov 0   ;;  %s1160_s16 = smov 0  }
   0xa   :  { %s1162_s17 = smov 0   ;;  %s1164_s18 = smov 0  }
   0xb   :  { %s1166_s19 = smov 0   ;;  %s1168_s20 = smov 0  }
   0xc   :  { %s1170_s21 = smov 0   ;;  %s1172_s22 = smov 0  }
   0xd LB: > { %s1197_s23 = sadd.s32 4294967295, %s1126_s22   ;;  %s1521_s24 = sadd.s32 4294967294, %s1126_s22   ;;  %s1126_s22 = sphi %s1172_s22, %s27_s22   ;;  %s1122_s21 = sphi %s1170_s21, %s1548_s21   ;;  %s1118_s20 = sphi %s1168_s20, %s1547_s20   ;;  %s1114_s19 = sphi %s1166_s19, %s1506_s19   ;;  %s1110_s18 = sphi %s1164_s18, %s1546_s18   ;;  %s1106_s17 = sphi %s1162_s17, %s1545_s17   ;;  %s1102_s16 = sphi %s1160_s16, %s1544_s16   ;;  %s1098_s15 = sphi %s1158_s15, %s1543_s15  }
   0xe   : > { %s39_s25 = sadd.s32 1, %s1122_s21  ;;  %p1095_p1 = scmp.ne.s32.totalorder %s1114_s19, 0 }
   0xf   : > { %p41_p0 = scmp.ge.s32.totalorder %s39_s25, 2  ;;  %p60_p2 = scmp.eq.s32.totalorder %s1126_s22, 0 }
  0x10   : > { %p65_p3 = scmp.ne.s32.totalorder %s1114_s19, %s1110_s18  ;;  %p66_p5 = scmp.eq.s32.totalorder %s1197_s23, 0 }
  0x11   : > { %s1550_s25 = smov (%p41_p0, %s39_s25), 0  ;;  %p1206_p4 = por %p1095_p1, %p60_p2 }
  0x12   : > { %p1211_p6 = por %p66_p5, %p65_p3  ;;  %s107_s28 = ssub.s32 %s1122_s21, %s1550_s25 }
  0x13   : > { %p108_p7 = scmp.eq.s32.totalorder %s107_s28, 0  ;;  %s110_s29 = sadd.s32 1, %s1106_s17 }
  0x14   : > { %p120_p8 = scmp.ne.s32.totalorder %s1106_s17, %s1102_s16  ;;  %p121_p9 = scmp.eq.s32.totalorder %s1197_s23, 1 }
  0x15   : > { %s1219_s30 = scalar_select %p108_p7, %s1106_s17, %s110_s29  }
  0x16   : > { %p126_p10 = scmp.ne.s32.totalorder %s1102_s16, %s1098_s15  ;;  %p127_p11 = scmp.eq.s32.totalorder %s1521_s24, 1 }
  0x17   : > { %p1228_p12 = por %p121_p9, %p120_p8  ;;  %p745_p13 = scmp.ge.s32.totalorder %s1126_s22, 2 }
  0x18   : > { %p1233_p0 = por %p127_p11, %p126_p10  ;;  %p798_p1 = scmp.lt.s32.totalorder %s1126_s22, 2 }
  0x19   : > { %s1528_s0 = sld [smem:[#allocation15_spill]]  ;;  %s1128_s10 = smov [#allocation2]  }
  0x1a   : > { %s214_s11 = sshll.u32 %s1128_s10, 4  ;;  %p1243_p2 = pnand %p798_p1, %p1206_p4  ;;  %s215_s11 = int_to_ptr.vmem [resolvable:$true] %s214_s11 }
  0x1b   : > { %p752_p3 = scmp.ge.s32.totalorder %s1126_s22, 1  ;;  %p247_p5 = scmp.lt.s32.totalorder %s1126_s22, 3 }
  0x1c   : > { %p903_p8 = pneg %p1243_p2 }
  0x1f   : > { %s212_s9 = sshll.u32 %s1528_s0, 4  ;;  %s906_s28 = scalar_lea.hbm %s1528_s0, 16  ;;  %s213_s9 = int_to_ptr.hbm [resolvable:$true] %s212_s9 }
  0x20   : > { %s899_s13 = sshra.s32 %s213_s9, 4  ;;  %s900_s13 = int_to_ptr.hbm [resolvable:$true] %s899_s13 }
  0x21   : > { %s901_s14 = scalar_lea.hbm %s900_s13, 16 }
  0x22   : > { %p902_p7 = scmp.ne.s32.totalorder %s900_s13, %s901_s14  ;;  %p908_p4 = scmp.lt.s32.totalorder %s906_s28, %s901_s14 }
  0x24   : > { %p904_p9 = pnand %p903_p8, %p902_p7 }
  0x26   : > { %p905_p10 = pneg %p904_p9 }
  0x28   : > { %p910_p11 = pnand %p908_p4, %p905_p10 }
  0x2a   : > { %913 = shalt.err (!%p910_p11)
}
  0x2b   : > { %s1129_s29 = smov 128   ;;  %s1130_s7 = smov 8  }
  0x2c   : > { %784 = dma.hbm_to_vmem [thread:$0]  (!%p1243_p2), %s213_s9, 256, %s215_s11, [#allocation3], %s1129_s29, %s1129_s29, %s1130_s7  }
  0x2d   : > { %p1263_p1 = pnand %p752_p3, %p247_p5  ;;  %s237_s14 = sshll.u32 %s1517_s1, 4  ;;  %s238_s14 = int_to_ptr.hbm [resolvable:$true] %s237_s14 }
  0x2e   : > { %s1131_s18 = smov [#allocation5]   ;;  %s929_s28 = sshra.s32 %s238_s14, 4  ;;  %s930_s28 = int_to_ptr.hbm [resolvable:$true] %s929_s28 }
  0x2f   : > { %s239_s26 = sshll.u32 %s1131_s18, 4  ;;  %s931_s24 = scalar_lea.hbm %s930_s28, 16  ;;  %s240_s26 = int_to_ptr.vmem [resolvable:$true] %s239_s26 }
  0x30   : > { %p932_p7 = scmp.ne.s32.totalorder %s930_s28, %s931_s24  ;;  %s936_s0 = scalar_lea.hbm %s1517_s1, 16 }
  0x31   : > { %p938_p3 = scmp.lt.s32.totalorder %s936_s0, %s931_s24 }
  0x32   : > { %p934_p9 = pnand %p932_p7, %p903_p8 }
  0x34   : > { %p935_p10 = pneg %p934_p9 }
  0x36   : > { %p940_p5 = pnand %p938_p3, %p935_p10 }
  0x38   : > { %943 = shalt.err (!%p940_p5)
}
  0x39   : > { %787 = dma.hbm_to_vmem [thread:$0]  (!%p1243_p2), %s238_s14, 256, %s240_s26, [#allocation6], %s1129_s29, %s1129_s29, %s1130_s7  }
  0x3a   : > { %251 = sbr.rel (%p1263_p1) target bundleno = 221 (0xdd), region = 28  ;;  %s253_s10 = sand.u32 (!%p1263_p1), 1, %s1114_s19  }
  0x3b   : > { %s753_s13 = sshll.u32 (!%p1263_p1), %s253_s10, 4  ;;  %s254_s18 = scalar_lea.sflag (!%p1263_p1), [#allocation3], %s253_s10 }
  0x3c   : > { %s257_s28 = scalar_lea.vmem (!%p1263_p1), [#allocation2], %s753_s13 }
  0x3f   : > { %1080 = dma.done.wait (%p1211_p6), %s254_s18, 256  }
  0x40   : > { %1082 = vsyncadd (%p1211_p6), %s254_s18, 4294967040  ;;  %s264_s0 = scalar_lea.sflag [#allocation6], %s253_s10  ;;  %s267_s24 = scalar_lea.vmem [#allocation5], %s753_s13 }
  0x41   : > { %1084 = dma.done.wait (%p1211_p6), %s264_s0, 256  }
  0x42   : > { %1086 = vsyncadd (%p1211_p6), %s264_s0, 4294967040  ;;  %s1522_s12 = sand.u32 1, %s1102_s16   ;;  %s758_s29 = sshll.u32 %s1118_s20, 4  ;;  %v1132_v0 = vmov 0.0   ;;  %v1304_v1 = vld [vmem:[%s257_s28] sm:$0xff]  ;;  %v1306_v2 = vld [vmem:[%s257_s28 + $0x8] sm:$0xff] }
  0x43   : > { %s755_s7 = sshll.u32 %s1522_s12, 3  ;;  %s1293_s8 = ssub.s32 16, %s758_s29  ;;  %v1308_v3 = vld [vmem:[%s267_s24] sm:$0xff]  ;;  %v1310_v4 = vld [vmem:[%s267_s24 + $0x8] sm:$0xff] }
  0x44   : > { %s1295_s14 = scalar_lea.vmem [#allocation7], %s755_s7  ;;  %s1298_s26 = scalar_lea.vmem [#allocation8], %s755_s7 }
  0x45   : > { %320 = vst [vmem:[%s1295_s14] sm:$0xff] %v1132_v0  ;;  %s1301_s27 = scalar_lea.vmem [#allocation10], %s755_s7  ;;  %p759_p6 = scmp.lt.s32.totalorder %s1293_s8, 16 }
  0x46   : > { %321 = vst [vmem:[%s1298_s26] sm:$0xff] %v1132_v0 }
  0x47   : > { %322 = vst [vmem:[%s1301_s27] sm:$0xff] %v1132_v0  ;;  %333 = sbr.rel (%p759_p6) target bundleno = 120 (0x78), region = 44 }
  0x4c   : > { %v334_v5 = vand.u32 2147483647, %v1304_v1  ;;  %v335_v6 = vand.u32 2147483647, %v1306_v2  ;;  %v380_v17 = vmax.f32 %v1304_v1, 0.0  ;;  %v381_v18 = vmax.f32 %v1306_v2, 0.0 }
  0x4d   : > { %v382_v19 = vmul.f32 %v1308_v3, %v1304_v1  ;;  %v383_v20 = vmul.f32 %v1310_v4, %v1306_v2  ;;  %vm374_vm10 = vcmp.ge.f32.partialorder %v1304_v1, 0.0  ;;  %vm375_vm11 = vcmp.ge.f32.partialorder %v1306_v2, 0.0 }
  0x4e   : > { %v336_v7 = vsub.f32 0.0, %v334_v5  ;;  %v337_v8 = vsub.f32 0.0, %v335_v6  ;;  %v418_v56 = vld [vmem:[%s1301_s27] sm:$0xff] }
  0x4f   : > { %v384_v27 = vsub.f32 %v380_v17, %v382_v19  ;;  %v385_v28 = vsub.f32 %v381_v18, %v383_v20 }
  0x50   : > { %v338_v9 = vmul.f32 1.442695, %v336_v7  ;;  %v340_v10 = vmul.f32 1.442695, %v337_v8 }
  0x52   : > { %875 = vpow2.f32 %v338_v9 }
  0x53   : > { %877 = vpow2.f32 %v340_v10 }
  0x58   : > { %v1315_v11 = vpop.eup %875 }
  0x59   : > { %v1317_v12 = vpop.eup %877  ;;  %v342_v13 = vadd.f32 1.0, %v1315_v11  ;;  %v389_v15 = vmul.f32 -0.5, %v1315_v11  ;;  %v392_v22 = vand.u32 2147483647, %v1315_v11 }
  0x5a   : > { %v343_v14 = vadd.f32 1.0, %v1317_v12  ;;  %v398_v16 = vmul.f32 -0.5, %v1317_v12  ;;  %v401_v24 = vand.u32 2147483647, %v1317_v12 }
  0x5b   : > { %879 = vrcp.f32 %v342_v13  ;;  %v390_v21 = vadd.f32 1.0, %v389_v15  ;;  %vm349_vm0 = vweird.f32 %v342_v13  ;;  %v353_v26 = vand.u32 2147483647, %v342_v13 }
  0x5c   : > { %881 = vrcp.f32 %v343_v14  ;;  %v399_v23 = vadd.f32 1.0, %v398_v16  ;;  %v355_v31 = vand.u32 2147483648, %v342_v13  ;;  %vm364_vm1 = vweird.f32 %v343_v14 }
  0x5d   : > { %883 = vlog2.f32 %v342_v13  ;;  %v391_v32 = vmul.f32 %v1315_v11, %v390_v21  ;;  %v370_v35 = vand.u32 2147483648, %v343_v14  ;;  %vm1332_vm2 = vcmp.lt.f32.partialorder %v392_v22, 0.0004427343 }
  0x5e   : > { %885 = vlog2.f32 %v343_v14  ;;  %v400_v37 = vmul.f32 %v1317_v12, %v399_v23  ;;  %vm1337_vm4 = vcmp.lt.f32.partialorder %v401_v24, 0.0004427343  ;;  %v368_v43 = vand.u32 2147483647, %v343_v14 }
  0x5f   : > { %v356_v48 = vor.u32 1.1754944e-38, %v355_v31  ;;  %vm354_vm7 = vcmp.eq.f32.partialorder %v353_v26, 8.507059e+37  ;;  %v371_v53 = vor.u32 1.1754944e-38, %v370_v35 }
  0x60   : > { %vm369_vm9 = vcmp.eq.f32.partialorder %v368_v43, 8.507059e+37 }
  0x61   : > { %v880_v25 = vpop.eup %879 }
  0x62   : > { %v882_v29 = vpop.eup %881  ;;  %v345_v30 = vmul.f32 %v880_v25, %v342_v13  ;;  %vm350_vm3 = vweird.f32 %v880_v25  ;;  %v406_v13 = vld [vmem:[%s1295_s14] sm:$0xff] }
  0x63   : > { %v884_v33 = vpop.eup %883  ;;  %v360_v34 = vmul.f32 %v882_v29, %v343_v14  ;;  %vm365_vm5 = vweird.f32 %v882_v29  ;;  %vm1344_vm6 = vmor %vm349_vm0, %vm350_vm3  ;;  %v412_v14 = vld [vmem:[%s1298_s26] sm:$0xff] }
  0x64   : > { %v886_v38 = vpop.eup %885  ;;  %v346_v39 = vsub.f32 1.0, %v345_v30  ;;  %v388_v40 = vmul.f32 0.6931472, %v884_v33  ;;  %vm366_vm8 = vmor %vm364_vm1, %vm365_vm5 }
  0x65   : > { %v361_v42 = vsub.f32 1.0, %v360_v34  ;;  %v397_v44 = vmul.f32 0.6931472, %v886_v38 }
  0x66   : > { %v347_v45 = vmul.f32 %v880_v25, %v346_v39  ;;  %v394_v46 = vsel %vm1332_vm2, %v391_v32, %v388_v40 }
  0x67   : > { %v362_v49 = vmul.f32 %v882_v29, %v361_v42  ;;  %v403_v50 = vsel %vm1337_vm4, %v400_v37, %v397_v44  ;;  %v404_v51 = vadd.f32 %v394_v46, %v384_v27 }
  0x68   : > { %v348_v52 = vadd.f32 %v880_v25, %v347_v45  ;;  %v405_v54 = vadd.f32 %v403_v50, %v385_v28 }
  0x69   : > { %v363_v55 = vadd.f32 %v882_v29, %v362_v49 }
  0x6a   : > { %v352_v57 = vsel %vm1344_vm6, %v880_v25, %v348_v52  ;;  %v419_v58 = vadd.f32 %v405_v54, %v404_v51 }
  0x6b   : > { %v357_v59 = vsel %vm354_vm7, %v356_v48, %v352_v57  ;;  %v367_v60 = vsel %vm366_vm8, %v882_v29, %v363_v55 }
  0x6c   : > { %v372_v61 = vsel %vm369_vm9, %v371_v53, %v367_v60  ;;  %v376_v62 = vmul.f32 %v1315_v11, %v357_v59  ;;  %v420_v63 = vadd.f32 %v419_v58, %v418_v56 }
  0x6d   : > { %v377_v0 = vmul.f32 %v1317_v12, %v372_v61 }
  0x6e   : > { %v378_v5 = vsel %vm374_vm10, %v357_v59, %v376_v62  ;;  %421 = vst [vmem:[%s1301_s27] sm:$0xff] %v420_v63 }
  0x6f   : > { %v379_v6 = vsel %vm375_vm11, %v372_v61, %v377_v0  ;;  %v407_v7 = vmul.f32 %v378_v5, %v1308_v3  ;;  %v413_v8 = vadd.f32 %v378_v5, %v1308_v3 }
  0x70   : > { %v408_v9 = vmul.f32 %v379_v6, %v1310_v4  ;;  %v414_v10 = vadd.f32 %v379_v6, %v1310_v4 }
  0x72   : > { %v409_v15 = vadd.f32 %v408_v9, %v407_v7  ;;  %v415_v11 = vadd.f32 %v414_v10, %v413_v8 }
  0x74   : > { %v410_v16 = vadd.f32 %v409_v15, %v406_v13  ;;  %v416_v17 = vadd.f32 %v415_v11, %v412_v14 }
  0x76   : > { %411 = vst [vmem:[%s1295_s14] sm:$0xff] %v410_v16 }
  0x77   : > { %417 = vst [vmem:[%s1298_s26] sm:$0xff] %v416_v17 }
  0x78 PF: > { %p760_p2 = scmp.ge.s32.totalorder %s1293_s8, 16 }
  0x7a   : > { %425 = sbr.rel (%p760_p2) target bundleno = 178 (0xb2), region = 48 }
  0x7f   : > { %v426_v12 = vlaneseq  ;;  %v429_v18 = vstv %s1293_s8  ;;  %v520_v10 = vld [vmem:[%s1301_s27] sm:$0xff] }
  0x81   : > { %v427_v19 = vshrl.u32 %v426_v12, 7 }
  0x83   : > { %v428_v20 = vadd.s32 8, %v427_v19  ;;  %vm1369_vm12 = vcmp.lt.s32.totalorder %v427_v19, %v429_v18 }
  0x84   : > { %v1376_v22 = vsel %vm1369_vm12, %v1304_v1, -100.0 }
  0x85   : > { %vm431_vm13 = vcmp.lt.s32.totalorder %v428_v20, %v429_v18  ;;  %v436_v23 = vand.u32 2147483647, %v1376_v22  ;;  %v482_v35 = vmax.f32 %v1376_v22, 0.0  ;;  %vm476_vm8 = vcmp.ge.f32.partialorder %v1376_v22, 0.0 }
  0x86   : > { %v1380_v24 = vsel %vm431_vm13, %v1306_v2, -100.0  ;;  %v1392_v2 = vsel %vm1369_vm12, %v1308_v3, 0.0  ;;  %v1395_v33 = vsel %vm431_vm13, %v1310_v4, 0.0 }
  0x87   : > { %v437_v25 = vand.u32 2147483647, %v1380_v24  ;;  %v438_v26 = vsub.f32 0.0, %v436_v23  ;;  %v483_v36 = vmax.f32 %v1380_v24, 0.0  ;;  %v484_v37 = vmul.f32 %v1392_v2, %v1376_v22 }
  0x88   : > { %v485_v38 = vmul.f32 %v1395_v33, %v1380_v24  ;;  %vm477_vm9 = vcmp.ge.f32.partialorder %v1380_v24, 0.0 }
  0x89   : > { %v439_v27 = vsub.f32 0.0, %v437_v25  ;;  %v440_v28 = vmul.f32 1.442695, %v438_v26  ;;  %v486_v42 = vsub.f32 %v482_v35, %v484_v37 }
  0x8a   : > { %v487_v43 = vsub.f32 %v483_v36, %v485_v38 }
  0x8b   : > { %887 = vpow2.f32 %v440_v28  ;;  %v442_v29 = vmul.f32 1.442695, %v439_v27  ;;  %v508_v27 = vld [vmem:[%s1295_s14] sm:$0xff]  ;;  %v514_v28 = vld [vmem:[%s1298_s26] sm:$0xff] }
  0x8d   : > { %889 = vpow2.f32 %v442_v29 }
  0x91   : > { %v1383_v30 = vpop.eup %887 }
  0x92   : > { %v444_v31 = vadd.f32 1.0, %v1383_v30  ;;  %v491_v1 = vmul.f32 -0.5, %v1383_v30  ;;  %v494_v39 = vand.u32 2147483647, %v1383_v30 }
  0x93   : > { %v1387_v32 = vpop.eup %889 }
  0x94   : > { %v445_v34 = vadd.f32 1.0, %v1387_v32  ;;  %891 = vrcp.f32 %v444_v31  ;;  %v492_v3 = vadd.f32 1.0, %v491_v1  ;;  %v500_v4 = vmul.f32 -0.5, %v1387_v32 }
  0x95   : > { %893 = vlog2.f32 %v444_v31  ;;  %v503_v40 = vand.u32 2147483647, %v1387_v32  ;;  %vm451_vm14 = vweird.f32 %v444_v31  ;;  %v455_v48 = vand.u32 2147483647, %v444_v31 }
  0x96   : > { %895 = vrcp.f32 %v445_v34  ;;  %v493_v44 = vmul.f32 %v1383_v30, %v492_v3  ;;  %v501_v45 = vadd.f32 1.0, %v500_v4  ;;  %vm1408_vm15 = vcmp.lt.f32.partialorder %v494_v39, 0.0004427343 }
  0x97   : > { %897 = vlog2.f32 %v445_v34  ;;  %v457_v51 = vand.u32 2147483648, %v444_v31  ;;  %vm466_vm0 = vweird.f32 %v445_v34  ;;  %vm504_vm2 = vcmp.lt.f32.partialorder %v503_v40, 0.0004427343 }
  0x98   : > { %v502_v53 = vmul.f32 %v1387_v32, %v501_v45  ;;  %v470_v57 = vand.u32 2147483647, %v445_v34  ;;  %v472_v58 = vand.u32 2147483648, %v445_v34  ;;  %vm456_vm5 = vcmp.eq.f32.partialorder %v455_v48, 8.507059e+37 }
  0x99   : > { %v458_v0 = vor.u32 1.1754944e-38, %v457_v51 }
  0x9a   : > { %v892_v41 = vpop.eup %891  ;;  %v473_v9 = vor.u32 1.1754944e-38, %v472_v58  ;;  %vm471_vm7 = vcmp.eq.f32.partialorder %v470_v57, 8.507059e+37 }
  0x9b   : > { %v894_v46 = vpop.eup %893  ;;  %v447_v47 = vmul.f32 %v892_v41, %v444_v31  ;;  %vm452_vm1 = vweird.f32 %v892_v41 }
  0x9c   : > { %v896_v50 = vpop.eup %895  ;;  %v490_v52 = vmul.f32 0.6931472, %v894_v46  ;;  %vm453_vm4 = vmor %vm451_vm14, %vm452_vm1 }
  0x9d   : > { %v898_v54 = vpop.eup %897  ;;  %v448_v55 = vsub.f32 1.0, %v447_v47  ;;  %v462_v56 = vmul.f32 %v896_v50, %v445_v34  ;;  %vm467_vm3 = vweird.f32 %v896_v50 }
  0x9e   : > { %v496_v59 = vsel %vm1408_vm15, %v493_v44, %v490_v52  ;;  %v499_v60 = vmul.f32 0.6931472, %v898_v54  ;;  %vm468_vm6 = vmor %vm466_vm0, %vm467_vm3 }
  0x9f   : > { %v449_v61 = vmul.f32 %v892_v41, %v448_v55  ;;  %v463_v62 = vsub.f32 1.0, %v462_v56  ;;  %v506_v63 = vadd.f32 %v496_v59, %v486_v42 }
  0xa0   : > { %v505_v5 = vsel %vm504_vm2, %v502_v53, %v499_v60 }
  0xa1   : > { %v450_v6 = vadd.f32 %v892_v41, %v449_v61  ;;  %v464_v7 = vmul.f32 %v896_v50, %v463_v62  ;;  %v507_v8 = vadd.f32 %v505_v5, %v487_v43 }
  0xa3   : > { %v454_v13 = vsel %vm453_vm4, %v892_v41, %v450_v6  ;;  %v465_v14 = vadd.f32 %v896_v50, %v464_v7  ;;  %v521_v15 = vadd.f32 %v507_v8, %v506_v63 }
  0xa4   : > { %v459_v11 = vsel %vm456_vm5, %v458_v0, %v454_v13 }
  0xa5   : > { %v469_v16 = vsel %vm468_vm6, %v896_v50, %v465_v14  ;;  %v478_v17 = vmul.f32 %v1383_v30, %v459_v11  ;;  %v522_v12 = vadd.f32 %v521_v15, %v520_v10 }
  0xa6   : > { %v474_v18 = vsel %vm471_vm7, %v473_v9, %v469_v16 }
  0xa7   : > { %v479_v19 = vmul.f32 %v1387_v32, %v474_v18  ;;  %v480_v20 = vsel %vm476_vm8, %v459_v11, %v478_v17  ;;  %523 = vst [vmem:[%s1301_s27] sm:$0xff] %v522_v12 }
  0xa8   : > { %v509_v21 = vmul.f32 %v480_v20, %v1392_v2  ;;  %v515_v23 = vadd.f32 %v480_v20, %v1392_v2 }
  0xa9   : > { %v481_v25 = vsel %vm477_vm9, %v474_v18, %v479_v19 }
  0xaa   : > { %v510_v22 = vmul.f32 %v481_v25, %v1395_v33  ;;  %v516_v26 = vadd.f32 %v481_v25, %v1395_v33 }
  0xac   : > { %v511_v29 = vadd.f32 %v510_v22, %v509_v21  ;;  %v517_v30 = vadd.f32 %v516_v26, %v515_v23 }
  0xae   : > { %v512_v31 = vadd.f32 %v511_v29, %v508_v27  ;;  %v518_v24 = vadd.f32 %v517_v30, %v514_v28 }
  0xb0   : > { %513 = vst [vmem:[%s1295_s14] sm:$0xff] %v512_v31 }
  0xb1   : > { %519 = vst [vmem:[%s1298_s26] sm:$0xff] %v518_v24 }
  0xb2 PF: > { %s529_s9 = sand.u32 1, %s1197_s23   ;;  %s1433_s11 = sshll.u32 %s1118_s20, 3 }
  0xb3   : > { %s559_s18 = scalar_lea.hbm %s1519_s3, %s1433_s11  ;;  %s561_s28 = sshll.u32 %s1298_s26, 4  ;;  %s562_s28 = int_to_ptr.vmem [resolvable:$true] %s561_s28 }
  0xb4   : > { %s563_s0 = sshll.u32 %s559_s18, 4  ;;  %s1440_s24 = scalar_lea.sflag [#allocation9], %s529_s9  ;;  %s564_s0 = int_to_ptr.hbm [resolvable:$true] %s563_s0 }
  0xb5   : > { %s973_s29 = sshra.s32 %s564_s0, 4  ;;  %s979_s8 = scalar_lea.hbm %s1519_s3, 16  ;;  %s974_s29 = int_to_ptr.hbm [resolvable:$true] %s973_s29 }
  0xb6   : > { %s975_s7 = scalar_lea.hbm %s974_s29, 8  ;;  %p980_p1 = scmp.lt.s32.totalorder %s974_s29, %s1519_s3 }
  0xb7   : > { %p976_p8 = scmp.ne.s32.totalorder %s974_s29, %s975_s7  ;;  %p981_p7 = scmp.lt.s32.totalorder %s979_s8, %s975_s7 }
  0xb9   : > { %p977_p4 = pnand %p976_p8, %p1228_p12  ;;  %p982_p9 = por %p981_p7, %p980_p1 }
  0xbb   : > { %p978_p11 = pneg %p977_p4 }
  0xbd   : > { %p983_p10 = pnand %p982_p9, %p978_p11 }
  0xbf   : > { %986 = shalt.err (!%p983_p10)
}
  0xc0   : > { %776 = dma.vmem_to_hbm [thread:$0]  (%p1228_p12), %s562_s28, 128, %s564_s0, %s1440_s24  }
  0xc1   : > { %s545_s13 = scalar_lea.hbm %s1518_s2, %s1433_s11  ;;  %s547_s18 = sshll.u32 %s1295_s14, 4  ;;  %s548_s18 = int_to_ptr.vmem [resolvable:$true] %s547_s18 }
  0xc2   : > { %s549_s20 = sshll.u32 %s545_s13, 4  ;;  %s1541_s12 = sand.u32 1, %s1102_s16   ;;  %s550_s20 = int_to_ptr.hbm [resolvable:$true] %s549_s20 }
  0xc3   : > { %s525_s29 = scalar_lea.sflag [#allocation4], %s1541_s12  ;;  %s1001_s7 = sshra.s32 %s550_s20, 4  ;;  %s1002_s7 = int_to_ptr.hbm [resolvable:$true] %s1001_s7 }
  0xc4   : > { %s1003_s23 = scalar_lea.hbm %s1002_s7, 8  ;;  %s1007_s28 = scalar_lea.hbm %s1518_s2, 16 }
  0xc5   : > { %p1004_p3 = scmp.ne.s32.totalorder %s1002_s7, %s1003_s23  ;;  %p1008_p2 = scmp.lt.s32.totalorder %s1002_s7, %s1518_s2 }
  0xc6   : > { %p1009_p8 = scmp.lt.s32.totalorder %s1007_s28, %s1003_s23 }
  0xc7   : > { %p1005_p5 = pnand %p1004_p3, %p1228_p12 }
  0xc8   : > { %p1010_p4 = por %p1009_p8, %p1008_p2 }
  0xc9   : > { %p1006_p6 = pneg %p1005_p5 }
  0xcb   : > { %p1011_p11 = pnand %p1010_p4, %p1006_p6 }
  0xcd   : > { %1014 = shalt.err (!%p1011_p11)
}
  0xce   : > { %775 = dma.vmem_to_hbm [thread:$0]  (%p1228_p12), %s548_s18, 128, %s550_s20, %s525_s29  }
  0xcf   : > { %s573_s13 = scalar_lea.hbm %s1520_s4, %s1433_s11  ;;  %s575_s12 = sshll.u32 %s1301_s27, 4  ;;  %s576_s12 = int_to_ptr.vmem [resolvable:$true] %s575_s12 }
  0xd0   : > { %s577_s8 = sshll.u32 %s573_s13, 4  ;;  %s1035_s0 = scalar_lea.hbm %s1520_s4, 16  ;;  %s578_s8 = int_to_ptr.hbm [resolvable:$true] %s577_s8 }
  0xd1   : > { %s1029_s10 = sshra.s32 %s578_s8, 4  ;;  %s1030_s10 = int_to_ptr.hbm [resolvable:$true] %s1029_s10 }
  0xd2   : > { %s1031_s7 = scalar_lea.hbm %s1030_s10, 8  ;;  %p1036_p10 = scmp.lt.s32.totalorder %s1030_s10, %s1520_s4 }
  0xd3   : > { %p1032_p1 = scmp.ne.s32.totalorder %s1030_s10, %s1031_s7  ;;  %p1037_p3 = scmp.lt.s32.totalorder %s1035_s0, %s1031_s7 }
  0xd5   : > { %p1033_p7 = pnand %p1032_p1, %p1228_p12  ;;  %p1038_p5 = por %p1037_p3, %p1036_p10 }
  0xd7   : > { %p1034_p9 = pneg %p1033_p7 }
  0xd9   : > { %p1039_p6 = pnand %p1038_p5, %p1034_p9 }
  0xdb   : > { %1042 = shalt.err (!%p1039_p6)
}
  0xdc   : > { %777 = dma.vmem_to_hbm [thread:$0]  (%p1228_p12), %s576_s12, 128, %s578_s8, %s1440_s24  }
  0xdd PF: > { %s589_s27 = sand.u32 1, %s1098_s15   ;;  %p789_p2 = pnand %p745_p13, %p1233_p0 }
  0xde   : > { %s590_s11 = scalar_lea.sflag [#allocation4], %s589_s27 }
  0xdf   : > { %p790_p8 = pneg %p789_p2 }
  0xe1   : > { %1088 = dma.done.wait (%p790_p8), %s590_s11, 128  }
  0xe2   : > { %1090 = vsyncadd (%p790_p8), %s590_s11, 4294967168  ;;  %s1542_s29 = sadd.s32 4294967294, %s1126_s22  }
  0xe3   : > { %s599_s26 = sand.u32 1, %s1542_s29  }
  0xe4   : > { %s600_s14 = scalar_lea.sflag [#allocation9], %s599_s26 }
  0xe5   : > { %1092 = dma.done.wait (%p790_p8), %s600_s14, 256  }
  0xe6   : > { %1094 = vsyncadd (%p790_p8), %s600_s14, 4294967040  ;;  %s27_s22 = sadd.s32 1, %s1126_s22   ;;  %s1543_s15 = smov %s1102_s16 }
  0xe7   : > { %p24_p12 = scmp.ge.s32.totalorder %s27_s22, 4   ;;  %s1544_s16 = smov %s1106_s17 }
  0xe8   : > { %s1545_s17 = smov %s1219_s30  ;;  %s1546_s18 = smov %s1114_s19 }
  0xe9   : > { %s1506_s19 = smov 0   ;;  %s1547_s20 = smov %s1122_s21 }
  0xea   : > { %s1548_s21 = smov %s1550_s25  ;;  %26 = sbr.rel (!%p24_p12) target bundleno = 13 (0xd), region = 130 }
  0xef   :  { %616 = vsyncpa [#allocation3], 1 }
  0xf0   :  { %618 = vsyncpa [#allocation3 + $0x1], 1 }
  0xf1   :  { %619 = vsyncpa [#allocation6], 1 }
  0xf2   :  { %621 = vsyncpa [#allocation6 + $0x1], 1 }
  0xf3   :  { %622 = vsyncpa [#allocation4], 1 }
  0xf4   :  { %624 = vsyncpa [#allocation4 + $0x1], 1 }
  0xf5   :  { %625 = vsyncpa [#allocation9], 1 }
  0xf6   :  { %627 = vsyncpa [#allocation9 + $0x1], 1 }

</bundles_post_ra>
